<compile_context>
chip_gen: v6e
topology: v6e:2x2x1
jax: 0.10.0
libtpu: 0.0.40
codegen_flags: <defaults>
</compile_context>

<pallas_src>
import numpy as np

import jax
import jax.numpy as jnp
from jax.experimental import pallas as pl
from jax.experimental.pallas import tpu as pltpu


# -----------------------------------------------------------------------------
# Deterministic Learner parameter construction (mirrors Meta.__init__; the
# parameters are never used because Meta.forward(x) is `return x`).
# -----------------------------------------------------------------------------
CONFIG = [
    ('conv2d', [32, 3, 3, 3, 1, 1]), ('relu', [True]), ('bn', [32]),
    ('conv2d', [64, 32, 4, 4, 2, 1]), ('relu', [True]), ('bn', [64]),
    ('conv2d', [128, 64, 4, 4, 2, 1]), ('relu', [True]), ('bn', [128]),
    ('conv2d', [256, 128, 4, 4, 2, 1]), ('relu', [True]), ('bn', [256]),
    ('convt2d', [256, 128, 4, 4, 2, 1]), ('relu', [True]), ('bn', [128]),
    ('convt2d', [128, 64, 4, 4, 2, 1]), ('relu', [True]), ('bn', [64]),
    ('convt2d', [64, 32, 4, 4, 2, 1]), ('relu', [True]), ('bn', [32]),
    ('convt2d', [32, 3, 3, 3, 1, 1]),
]


def build_learner_params(key):
    """Deterministically build the Learner's parameter pytree (shapes only)."""
    params = []
    for name, arg in CONFIG:
        if name == 'conv2d':
            c_out, c_in, kh, kw = arg[0], arg[1], arg[2], arg[3]
            key, k1 = jax.random.split(key)
            w = jax.random.normal(k1, (c_out, c_in, kh, kw), jnp.float32) * 0.02
            b = jnp.zeros((c_out,), jnp.float32)
            params.append({'w': w, 'b': b})
        elif name == 'convt2d':
            c_in, c_out, kh, kw = arg[0], arg[1], arg[2], arg[3]
            key, k1 = jax.random.split(key)
            w = jax.random.normal(k1, (c_in, c_out, kh, kw), jnp.float32) * 0.02
            b = jnp.zeros((c_out,), jnp.float32)
            params.append({'w': w, 'b': b})
        elif name == 'bn':
            c = arg[0]
            params.append({
                'gamma': jnp.ones((c,), jnp.float32),
                'beta': jnp.zeros((c,), jnp.float32),
                'running_mean': jnp.zeros((c,), jnp.float32),
                'running_var': jnp.ones((c,), jnp.float32),
            })
        # relu has no parameters
    return params
# TODO(synk): Learner params are constructed but never used — Meta.forward(x) is `return x`.


# -----------------------------------------------------------------------------
# Pallas identity (pass-through) kernel: a single HBM->HBM DMA.
# -----------------------------------------------------------------------------
def _identity_dma_kernel(x_hbm, o_hbm, sem):
    # One DMA descriptor copies the whole array HBM->HBM; no VMEM staging,
    # no grid, no per-step pipeline overhead.
    cp = pltpu.make_async_copy(x_hbm, o_hbm, sem)
    cp.start()
    cp.wait()


def meta_forward(x):
    """Meta.forward(x) == x.

    Fastest correct implementation is `return x` (zero bytes moved).  The
    Pallas form below is the minimum-overhead realization when a kernel is
    required: one whole-array HBM->HBM async copy.
    """
    return pl.pallas_call(
        _identity_dma_kernel,
        out_shape=jax.ShapeDtypeStruct(x.shape, x.dtype),
        in_specs=[pl.BlockSpec(memory_space=pl.ANY)],
        out_specs=pl.BlockSpec(memory_space=pl.ANY),
        scratch_shapes=[pltpu.SemaphoreType.DMA(())],
    )(x)


if __name__ == "__main__":
    key = jax.random.PRNGKey(0)
    key, kx, kp = jax.random.split(key, 3)

    # CIFAR-like input (small): batch=2, channels=3, spatial=32 (NCHW),
    # matching the Learner(config, 3, 32) construction.
    x = jax.random.normal(kx, (2, 3, 32, 32), jnp.float32)
    x_host = np.asarray(x)  # host snapshot for the correctness check

    # Build (unused) Learner parameters deterministically, as Meta.__init__ does.
    _learner_params = build_learner_params(kp)
    jax.block_until_ready(_learner_params)

    y = meta_forward(x)
    y = jax.block_until_ready(y)

    assert y.shape == x_host.shape and y.dtype == x_host.dtype
    assert np.array_equal(np.asarray(y), x_host)
    print("KERNEL_OK")
</pallas_src>

<mosaic_0001>
module attributes {stable_mosaic.version = 11 : i64} {
  func.func @_identity_dma_kernel(%arg0: memref<2x3x32x32xf32, #tpu.memory_space<any>>, %arg1: memref<2x3x32x32xf32, #tpu.memory_space<any>>, %arg2: memref<!tpu.dma_semaphore, #tpu.memory_space<semaphore_mem>>) attributes {dimension_semantics = [], scalar_prefetch = 0 : i64, scratch_operands = 1 : i64, tpu.core_type = #tpu.core_type<tc>} {
    tpu.enqueue_dma source(%arg0 : memref<2x3x32x32xf32, #tpu.memory_space<any>>) target(%arg1 : memref<2x3x32x32xf32, #tpu.memory_space<any>>) target_semaphore(%arg2 : memref<!tpu.dma_semaphore, #tpu.memory_space<semaphore_mem>>)
    tpu.wait_dma2 semaphore(%arg2 : memref<!tpu.dma_semaphore, #tpu.memory_space<semaphore_mem>>) src(%arg0 : memref<2x3x32x32xf32, #tpu.memory_space<any>>) dst(%arg1 : memref<2x3x32x32xf32, #tpu.memory_space<any>>)
    return
  }
}

</mosaic_0001>

<bundles_post_ra>
// kernel: tpu_custom_call.1
= control target key start
LH: loop header
LB: loop body
LE: loop exit
PB: predicated region body
PF: predicated region fallthrough
CT: control target
= control target key end

     0   :  { %s30_s6 = smov [#allocation2]   ;;  %s31_s7 = smov 131072   ;;  %s49_s0 = inlined_call_operand.hbm [shape: f32[2,3,32,32], index: 0, kind: input, shape index: {}]   ;;  %s50_s1 = inlined_call_operand.hbm [shape: f32[2,3,32,32], index: 1, kind: output, shape index: {}]  }
   0x1   :  { %s32_s8 = smov 0  }
   0x2   :  { %12 = dma.general %s49_s0, 3072, %s50_s1, %s30_s6, %s31_s7, [#allocation4], %s32_s8, 0  }
   0x3   :  { %28 = dma.done.wait [#allocation2], 3072 }
   0x4   :  { %29 = vsyncadd [#allocation2], 4294964224 }
   0x5   :  { %18 = vsyncmov [#allocation2] }
   0x8   :  { %s19_s13 = vpop.sfrf %18 }
   0x9   :  { %p24_p0 = scmp.ne.s32.totalorder %s19_s13, 0 }
   0xb   :  { %23 = shalt.err (%p24_p0)  }

</bundles_post_ra>
